<compile_context>
chip_gen: v7x
topology: tpu7x:2x2x1
jax: 0.10.0
libtpu: 0.0.40
codegen_flags: <defaults>
</compile_context>

<pallas_src>
import jax
import jax.numpy as jnp
import numpy as np
from jax.experimental import pallas as pl
from jax.experimental.pallas import tpu as pltpu

# Fixed (non-trainable) profile weights from the torch module.
_C, _D, _E = 0.5, -0.3, -5.5
PAD = 2

# out = _W5*S5 + _W3*S3 + _WC*x  ==  conv2d(x, profile, padding=2)
_W5 = _C          # weight of the 5x5 box sum
_W3 = _D - _C     # extra weight of the 3x3 box sum
_WC = _E - _D     # extra weight of the center tap


def _profile_weight() -> jnp.ndarray:
    c, d, e = _C, _D, _E
    profile = [
        [c, c, c, c, c],
        [c, d, d, d, c],
        [c, d, e, d, c],
        [c, d, d, d, c],
        [c, c, c, c, c],
    ]
    return jnp.asarray(profile, dtype=jnp.float32)


def _round_up(v: int, m: int) -> int:
    return (v + m - 1) // m * m


def _make_kernel(BN: int, H: int, W: int, HWp: int, out_dtype):
    HW = H * W

    def kernel(x_ref, wpos_ref, o_ref):
        # x_ref:    (BN, HWp)  flattened images, native dtype
        # wpos_ref: (1,  HWp)  int32 column index (flat % W) of every lane
        # o_ref:    (BN, HWp)  output, native dtype
        x = x_ref[...].astype(jnp.float32)

        # Hoisted positional info (computed once per block).
        wpos = jnp.broadcast_to(wpos_ref[...], (BN, HWp))
        lane = jax.lax.broadcasted_iota(jnp.int32, (BN, HWp), 1)

        def sh(a, s, valid):
            # Value shifted by s along the flat lane axis (circular XLU roll);
            # wrapped / out-of-image lanes are zeroed == conv zero padding.
            return jnp.where(valid, pltpu.roll(a, shift=s % HWp, axis=1), 0.0)

        # Column pass (W direction): +/-1, +/-2 lane shifts.
        col3 = x + sh(x, 1, wpos >= 1) + sh(x, -1, wpos < W - 1)
        col5 = col3 + sh(x, 2, wpos >= 2) + sh(x, -2, wpos < W - 2)

        # Row pass (H direction): a +/-k row shift is a +/-k*W lane shift.
        up1, dn1 = lane >= W, lane < HW - W
        up2, dn2 = lane >= 2 * W, lane < HW - 2 * W
        s3 = col3 + sh(col3, W, up1) + sh(col3, -W, dn1)
        s5 = (col5 + sh(col5, W, up1) + sh(col5, -W, dn1)
              + sh(col5, 2 * W, up2) + sh(col5, -2 * W, dn2))

        # out = 0.5*S5 - 0.8*S3 - 5.2*x
        o_ref[...] = (_W5 * s5 + _W3 * s3 + _WC * x).astype(out_dtype)

    return kernel


def _vmem_capacity_bytes() -> int:
    try:
        return int(pltpu.get_tpu_info().vmem_capacity_bytes)
    except Exception:
        return 64 << 20          # conservative (v7x-sized) fallback


def _choose_block_n(N: int, HWp: int, itemsize: int, vmem_cap: int) -> int:
    # Live-block budget: 24 MiB on 128 MiB parts (v5e/v6e), 16 MiB on v7x;
    # leaves plenty of headroom for compiler temporaries / second TC.
    budget = min(max(vmem_cap // 4, 8 << 20), 24 << 20)
    # Per image row: 2x double-buffered in + out blocks (native dtype) plus
    # ~10 f32-sized live temporaries (x, col3/5, rolled terms, s3/5, masks).
    per_img = 4 * itemsize * HWp + 10 * 4 * HWp
    bn = max(1, int(budget // per_img))
    if bn >= N:
        return N                                  # one block: no split, no tail
    if bn >= 8:
        bn = (bn // 8) * 8                        # sublane-tile friendly blocks
        if N >= 64:
            # >=4 grid steps so both v7x TensorCores get >=2 pipelined blocks.
            bn = min(bn, max(8, _round_up(pl.cdiv(N, 4), 8)))
    return int(bn)


def profile_conv2d(x: jnp.ndarray, *, block_n: int | None = None) -> jnp.ndarray:
    """x: (N, 1, H, W) -> (N, 1, H, W), == F.conv2d(x, profile_weight, padding=2)."""
    assert x.ndim == 4 and x.shape[1] == 1, "ProfileConv2d expects NCHW with C=1"
    N, _, H, W = x.shape
    HW = H * W
    HWp = _round_up(HW, 128)                      # lane-dense, roll-aligned axis
    dtype = x.dtype
    itemsize = jnp.dtype(dtype).itemsize

    # Free metadata reshape (contiguous dims collapse); only pay a real pad
    # pass when H*W is not already a multiple of 128.
    x_flat = x.reshape(N, HW)
    if HWp != HW:
        x_flat = jnp.pad(x_flat, ((0, 0), (0, HWp - HW)))

    # Host-precomputed column-index table: avoids in-kernel integer division.
    wpos = jnp.asarray((np.arange(HWp) % W).astype(np.int32).reshape(1, HWp))

    vmem_cap = _vmem_capacity_bytes()
    bn = block_n if block_n is not None else _choose_block_n(N, HWp, itemsize, vmem_cap)
    bn = min(bn, N)
    n_blocks = pl.cdiv(N, bn)                     # ragged tail handled by Pallas masking

    out = pl.pallas_call(
        _make_kernel(bn, H, W, HWp, dtype),
        out_shape=jax.ShapeDtypeStruct((N, HWp), dtype),
        grid_spec=pltpu.PrefetchScalarGridSpec(
            num_scalar_prefetch=0,
            grid=(n_blocks,),
            in_specs=[
                pl.BlockSpec((bn, HWp), lambda n: (n, 0)),
                pl.BlockSpec((1, HWp), lambda n: (0, 0)),
            ],
            out_specs=pl.BlockSpec((bn, HWp), lambda n: (n, 0)),
        ),
        compiler_params=pltpu.CompilerParams(
            dimension_semantics=("parallel",),
            vmem_limit_bytes=min(int(vmem_cap * 3 // 4), 100 << 20),
        ),
        cost_estimate=pl.CostEstimate(
            flops=25 * N * HW,
            transcendentals=0,
            bytes_accessed=2 * N * HWp * itemsize,
        ),
    )(x_flat, wpos)

    if HWp != HW:
        out = out[:, :HW]
    return out.reshape(N, 1, H, W)


if __name__ == "__main__":
    k1, k2, k3 = jax.random.split(jax.random.PRNGKey(0), 3)
    w4 = _profile_weight()[None, None, :, :]      # (O=1, I=1, 5, 5)

    def ref_conv(x):
        return jax.lax.conv_general_dilated(
            x.astype(jnp.float32), w4, window_strides=(1, 1),
            padding=((PAD, PAD), (PAD, PAD)),
            dimension_numbers=("NCHW", "OIHW", "NCHW"),
        )

    # Case 1: NCHW single-channel, H*W already a multiple of 128 (fast path).
    x1 = jax.random.normal(k1, (2, 1, 16, 16), dtype=jnp.float32)
    y1 = profile_conv2d(x1)
    jax.block_until_ready(y1)
    assert y1.shape == x1.shape
    assert jnp.allclose(y1, ref_conv(x1), atol=1e-4, rtol=1e-4), "mismatch (case 1)"

    # Case 2: non-square image, H*W = 192 (exercises the lane-padded path).
    x2 = jax.random.normal(k2, (5, 1, 8, 24), dtype=jnp.float32)
    y2 = profile_conv2d(x2)
    jax.block_until_ready(y2)
    assert y2.shape == x2.shape
    assert jnp.allclose(y2, ref_conv(x2), atol=1e-4, rtol=1e-4), "mismatch (case 2)"

    # Case 3: multi-block grid with a ragged final batch block (N=20, bn=8).
    x3 = jax.random.normal(k3, (20, 1, 16, 16), dtype=jnp.float32)
    y3 = profile_conv2d(x3, block_n=8)
    jax.block_until_ready(y3)
    assert y3.shape == x3.shape
    assert jnp.allclose(y3, ref_conv(x3), atol=1e-4, rtol=1e-4), "mismatch (case 3)"

    print("KERNEL_OK")
</pallas_src>

<mosaic_0001>
module attributes {stable_mosaic.version = 11 : i64} {
  func.func @kernel(%arg0: i32, %arg1: memref<2x256xf32, #tpu.memory_space<vmem>>, %arg2: memref<1x256xi32, #tpu.memory_space<vmem>>, %arg3: memref<2x256xf32, #tpu.memory_space<vmem>>) attributes {dimension_semantics = [#tpu.dimension_semantics<parallel>], iteration_bounds = array<i64: 1>, scalar_prefetch = 0 : i64, scratch_operands = 0 : i64, tpu.core_type = #tpu.core_type<tc>, window_params = [{transform_indices = @transform_0, window_bounds = array<i64: 2, 256>}, {pipeline_mode = #tpu.pipeline_mode<synchronous>, transform_indices = @transform_1, window_bounds = array<i64: 1, 256>}, {transform_indices = @transform_2, window_bounds = array<i64: 2, 256>}]} {
    %c0 = arith.constant 0 : index
    %c0_0 = arith.constant 0 : index
    %0 = vector.load %arg1[%c0, %c0_0] : memref<2x256xf32, #tpu.memory_space<vmem>>, vector<2x256xf32>
    %c0_1 = arith.constant 0 : index
    %c0_2 = arith.constant 0 : index
    %1 = vector.load %arg2[%c0_1, %c0_2] : memref<1x256xi32, #tpu.memory_space<vmem>>, vector<1x256xi32>
    %2 = vector.shape_cast %1 : vector<1x256xi32> to vector<1x256xi32>
    %3 = vector.broadcast %2 : vector<1x256xi32> to vector<2x256xi32>
    %4 = tpu.iota {dimensions = array<i32: 1>} : vector<2x256xi32>
    %c1_i32 = arith.constant 1 : i32
    %5 = vector.broadcast %c1_i32 : i32 to vector<2x256xi32>
    %6 = arith.cmpi sge, %3, %5 : vector<2x256xi32>
    %c1_i32_3 = arith.constant 1 : i32
    %7 = tpu.dynamic_rotate %0 by %c1_i32_3 dim 1 : vector<2x256xf32>, i32 -> vector<2x256xf32>
    %cst = arith.constant 0.000000e+00 : f32
    %8 = vector.broadcast %cst : f32 to vector<2x256xf32>
    %9 = arith.select %6, %7, %8 : vector<2x256xi1>, vector<2x256xf32>
    %10 = arith.addf %0, %9 : vector<2x256xf32>
    %c15_i32 = arith.constant 15 : i32
    %11 = vector.broadcast %c15_i32 : i32 to vector<2x256xi32>
    %12 = arith.cmpi slt, %3, %11 : vector<2x256xi32>
    %c255_i32 = arith.constant 255 : i32
    %13 = tpu.dynamic_rotate %0 by %c255_i32 dim 1 : vector<2x256xf32>, i32 -> vector<2x256xf32>
    %cst_4 = arith.constant 0.000000e+00 : f32
    %14 = vector.broadcast %cst_4 : f32 to vector<2x256xf32>
    %15 = arith.select %12, %13, %14 : vector<2x256xi1>, vector<2x256xf32>
    %16 = arith.addf %10, %15 : vector<2x256xf32>
    %c2_i32 = arith.constant 2 : i32
    %17 = vector.broadcast %c2_i32 : i32 to vector<2x256xi32>
    %18 = arith.cmpi sge, %3, %17 : vector<2x256xi32>
    %c2_i32_5 = arith.constant 2 : i32
    %19 = tpu.dynamic_rotate %0 by %c2_i32_5 dim 1 : vector<2x256xf32>, i32 -> vector<2x256xf32>
    %cst_6 = arith.constant 0.000000e+00 : f32
    %20 = vector.broadcast %cst_6 : f32 to vector<2x256xf32>
    %21 = arith.select %18, %19, %20 : vector<2x256xi1>, vector<2x256xf32>
    %22 = arith.addf %16, %21 : vector<2x256xf32>
    %c14_i32 = arith.constant 14 : i32
    %23 = vector.broadcast %c14_i32 : i32 to vector<2x256xi32>
    %24 = arith.cmpi slt, %3, %23 : vector<2x256xi32>
    %c254_i32 = arith.constant 254 : i32
    %25 = tpu.dynamic_rotate %0 by %c254_i32 dim 1 : vector<2x256xf32>, i32 -> vector<2x256xf32>
    %cst_7 = arith.constant 0.000000e+00 : f32
    %26 = vector.broadcast %cst_7 : f32 to vector<2x256xf32>
    %27 = arith.select %24, %25, %26 : vector<2x256xi1>, vector<2x256xf32>
    %28 = arith.addf %22, %27 : vector<2x256xf32>
    %c16_i32 = arith.constant 16 : i32
    %29 = vector.broadcast %c16_i32 : i32 to vector<2x256xi32>
    %30 = arith.cmpi sge, %4, %29 : vector<2x256xi32>
    %c240_i32 = arith.constant 240 : i32
    %31 = vector.broadcast %c240_i32 : i32 to vector<2x256xi32>
    %32 = arith.cmpi slt, %4, %31 : vector<2x256xi32>
    %c32_i32 = arith.constant 32 : i32
    %33 = vector.broadcast %c32_i32 : i32 to vector<2x256xi32>
    %34 = arith.cmpi sge, %4, %33 : vector<2x256xi32>
    %c224_i32 = arith.constant 224 : i32
    %35 = vector.broadcast %c224_i32 : i32 to vector<2x256xi32>
    %36 = arith.cmpi slt, %4, %35 : vector<2x256xi32>
    %c16_i32_8 = arith.constant 16 : i32
    %37 = tpu.dynamic_rotate %16 by %c16_i32_8 dim 1 : vector<2x256xf32>, i32 -> vector<2x256xf32>
    %cst_9 = arith.constant 0.000000e+00 : f32
    %38 = vector.broadcast %cst_9 : f32 to vector<2x256xf32>
    %39 = arith.select %30, %37, %38 : vector<2x256xi1>, vector<2x256xf32>
    %40 = arith.addf %16, %39 : vector<2x256xf32>
    %c240_i32_10 = arith.constant 240 : i32
    %41 = tpu.dynamic_rotate %16 by %c240_i32_10 dim 1 : vector<2x256xf32>, i32 -> vector<2x256xf32>
    %cst_11 = arith.constant 0.000000e+00 : f32
    %42 = vector.broadcast %cst_11 : f32 to vector<2x256xf32>
    %43 = arith.select %32, %41, %42 : vector<2x256xi1>, vector<2x256xf32>
    %44 = arith.addf %40, %43 : vector<2x256xf32>
    %c16_i32_12 = arith.constant 16 : i32
    %45 = tpu.dynamic_rotate %28 by %c16_i32_12 dim 1 : vector<2x256xf32>, i32 -> vector<2x256xf32>
    %cst_13 = arith.constant 0.000000e+00 : f32
    %46 = vector.broadcast %cst_13 : f32 to vector<2x256xf32>
    %47 = arith.select %30, %45, %46 : vector<2x256xi1>, vector<2x256xf32>
    %48 = arith.addf %28, %47 : vector<2x256xf32>
    %c240_i32_14 = arith.constant 240 : i32
    %49 = tpu.dynamic_rotate %28 by %c240_i32_14 dim 1 : vector<2x256xf32>, i32 -> vector<2x256xf32>
    %cst_15 = arith.constant 0.000000e+00 : f32
    %50 = vector.broadcast %cst_15 : f32 to vector<2x256xf32>
    %51 = arith.select %32, %49, %50 : vector<2x256xi1>, vector<2x256xf32>
    %52 = arith.addf %48, %51 : vector<2x256xf32>
    %c32_i32_16 = arith.constant 32 : i32
    %53 = tpu.dynamic_rotate %28 by %c32_i32_16 dim 1 : vector<2x256xf32>, i32 -> vector<2x256xf32>
    %cst_17 = arith.constant 0.000000e+00 : f32
    %54 = vector.broadcast %cst_17 : f32 to vector<2x256xf32>
    %55 = arith.select %34, %53, %54 : vector<2x256xi1>, vector<2x256xf32>
    %56 = arith.addf %52, %55 : vector<2x256xf32>
    %c224_i32_18 = arith.constant 224 : i32
    %57 = tpu.dynamic_rotate %28 by %c224_i32_18 dim 1 : vector<2x256xf32>, i32 -> vector<2x256xf32>
    %cst_19 = arith.constant 0.000000e+00 : f32
    %58 = vector.broadcast %cst_19 : f32 to vector<2x256xf32>
    %59 = arith.select %36, %57, %58 : vector<2x256xi1>, vector<2x256xf32>
    %60 = arith.addf %56, %59 : vector<2x256xf32>
    %cst_20 = arith.constant 5.000000e-01 : f32
    %61 = vector.broadcast %cst_20 : f32 to vector<2x256xf32>
    %62 = arith.mulf %61, %60 : vector<2x256xf32>
    %cst_21 = arith.constant -8.000000e-01 : f32
    %63 = vector.broadcast %cst_21 : f32 to vector<2x256xf32>
    %64 = arith.mulf %63, %44 : vector<2x256xf32>
    %65 = arith.addf %62, %64 : vector<2x256xf32>
    %cst_22 = arith.constant -5.200000e+00 : f32
    %66 = vector.broadcast %cst_22 : f32 to vector<2x256xf32>
    %67 = arith.mulf %66, %0 : vector<2x256xf32>
    %68 = arith.addf %65, %67 : vector<2x256xf32>
    %c0_23 = arith.constant 0 : index
    %c0_24 = arith.constant 0 : index
    %69 = vector.load %arg3[%c0_23, %c0_24] : memref<2x256xf32, #tpu.memory_space<vmem>>, vector<2x256xf32>
    tpu.vector_store %arg3[%c0_23, %c0_24], %68 {strides = array<i32>} : memref<2x256xf32, #tpu.memory_space<vmem>>, vector<2x256xf32>,
    return
  }
  func.func @transform_0(%arg0: i32) -> (i32, i32) {
    %c0_i32 = arith.constant 0 : i32
    %c0_i32_0 = arith.constant 0 : i32
    return %arg0, %c0_i32 : i32, i32
  }
  func.func @transform_1(%arg0: i32) -> (i32, i32) {
    %c0_i32 = arith.constant 0 : i32
    %c0_i32_0 = arith.constant 0 : i32
    %c0_i32_1 = arith.constant 0 : i32
    return %c0_i32, %c0_i32_0 : i32, i32
  }
  func.func @transform_2(%arg0: i32) -> (i32, i32) {
    %c0_i32 = arith.constant 0 : i32
    %c0_i32_0 = arith.constant 0 : i32
    return %arg0, %c0_i32 : i32, i32
  }
}

</mosaic_0001>

<bundles_post_ra>
// kernel: tpu_custom_call.1
= control target key start
LH: loop header
LB: loop body
LE: loop exit
PB: predicated region body
PF: predicated region fallthrough
CT: control target
= control target key end

     0   :  { %7 = vsyncpa [#allocation3], 0  ;;  %s477_s0 = inlined_call_operand.hbm [shape: f32[2,256], index: 0, kind: input, shape index: {}]   ;;  %s478_s1 = inlined_call_operand.vmem [shape: s32[1,256], index: 1, kind: input, shape index: {}]   ;;  %s479_s2 = inlined_call_operand.hbm [shape: f32[2,256], index: 2, kind: output, shape index: {}]  }
   0x1   :  { %8 = vsyncpa [#allocation4], 0  ;;  %s374_s9 = smov [#allocation2]   ;;  %s326_s13 = scalar_lea.hbm %s477_s0, 64 }
   0x2   :  { %s15_s10 = sshll.u32 %s374_s9, 4  ;;  %p327_p0 = scmp.ne.s32.totalorder %s477_s0, %s326_s13  ;;  %s16_s10 = int_to_ptr.vmem [resolvable:$true] %s15_s10 }
   0x3   :  { %p330_p1 = scmp.lt.u32.totalorder %s326_s13, %s477_s0 }
   0x5   :  { %p332_p2 = pnand %p330_p1, %p327_p0 }
   0x7   :  { %335 = shalt.err (!%p332_p2)
}
   0x8   :  { %s336_s18 = scalar_lea.vmem %s16_s10, 64  ;;  %p341_p4 = scmp.lt.s32.totalorder %s16_s10, %s16_s10 }
   0x9   :  { %p337_p3 = scmp.ne.s32.totalorder %s16_s10, %s336_s18  ;;  %p342_p5 = scmp.lt.s32.totalorder %s336_s18, %s336_s18 }
   0xb   :  { %p343_p6 = por %p342_p5, %p341_p4 }
   0xd   :  { %p344_p7 = pnand %p343_p6, %p337_p3 }
   0xf   :  { %347 = shalt.err (!%p344_p7)
}
  0x10   :  { %18 = dma.hbm_to_vmem [thread:$0]  %s477_s0, 64, %s16_s10, [#allocation3]  }
  0x11   :  { %370 = dma.done.wait [#allocation3], 64  }
  0x12   :  { %371 = vsyncadd [#allocation3], 4294967232  ;;  %v26_v0 = vlaneseq  ;;  %v375_v1 = vmov 1983009808   ;;  %v414_v6 = vld [vmem:[#allocation2] sm:$0xf] }
  0x13   :  { %v41_v2 = vunpack.c.l.s4 %v375_v1  ;;  %s376_s21 = smov 127   ;;  %s377_s22 = smov 1   ;;  %v25_v11 = vld [vmem:[%s478_s1] sm:$0x3] }
  0x14   :  { %v27_v3 = vshrl.u32 %v26_v0, 7  ;;  %s378_s0 = smov 2   ;;  %s379_s23 = smov 126   ;;  %v421_v12 = vand.u32 127, %v26_v0 }
  0x15   :  { %v42_v4 = vunpack.c.0.s8 %v41_v2  ;;  %s380_s1 = smov 16   ;;  %s381_s26 = smov 112  }
  0x16   :  { %v28_v9 = vsub.s32 0, %v27_v3  ;;  %v32_v10 = vsub.s32 1, %v27_v3  ;;  %vm77_vm0 = vcmp.lt.s32.totalorder %v421_v12, 127  ;;  %vm54_vm1 = vcmp.lt.s32.totalorder %v421_v12, 1  ;;  %s382_s27 = smov 32   ;;  %s383_s28 = smov 96  }
  0x17   :  { %v412_v5 = vsub.s32 %v42_v4, %v27_v3  ;;  %vm100_vm6 = vcmp.lt.s32.totalorder %v421_v12, 2  ;;  %vm123_vm10 = vcmp.lt.s32.totalorder %v421_v12, 126  ;;  %vm163_vm12 = vcmp.lt.s32.totalorder %v421_v12, 16  ;;  %s384_s29 = smov [#allocation5]  }
  0x18   :  { %v29_v13 = vrot.slane %v25_v11, %v28_v9  ;;  %v33_v14 = vrot.slane %v25_v11, %v32_v10  ;;  %v36_v59 = vadd.s32 128, %v421_v12  ;;  %vm184_vm13 = vcmp.lt.s32.totalorder %v421_v12, 112  ;;  %s306_s30 = sshll.u32 %s384_s29, 4  ;;  %s307_s30 = int_to_ptr.vmem [resolvable:$true] %s306_s30 }
  0x19   :  { %v46_v7 = vrot.slane %v414_v6, %v412_v5  ;;  %vm140_vm14 = vcmp.ge.s32.totalorder %v421_v12, 16  ;;  %s348_s3 = scalar_lea.vmem %s307_s30, 64  ;;  %p353_p9 = scmp.lt.s32.totalorder %s307_s30, %s307_s30 }
  0x1a   :  { %vm71_vm2 = vcmp.lt.s32.totalorder %v29_v13, 15  ;;  %vm72_vm3 = vcmp.lt.s32.totalorder %v33_v14, 15  ;;  %vm37_vm4 = vcmp.ge.s32.totalorder %v29_v13, 1  ;;  %vm38_vm5 = vcmp.ge.s32.totalorder %v33_v14, 1  ;;  %p349_p8 = scmp.ne.s32.totalorder %s307_s30, %s348_s3  ;;  %p354_p10 = scmp.lt.s32.totalorder %s348_s3, %s348_s3 }
  0x1b   :  { %73 = vrot.lane.b32.xlu1 %v46_v7, %s376_s21  ;;  %50 = vrot.lane.b32.xlu0 %v46_v7, %s377_s22  ;;  %v47_v8 = vcombine.high %v46_v7, %v46_v7  ;;  %vm94_vm7 = vcmp.ge.s32.totalorder %v29_v13, 2  ;;  %vm95_vm8 = vcmp.ge.s32.totalorder %v33_v14, 2  ;;  %vm117_vm9 = vcmp.lt.s32.totalorder %v29_v13, 14 }
  0x1c   :  { %vm118_vm11 = vcmp.lt.s32.totalorder %v33_v14, 14  ;;  %vm143_vm15 = vcmp.lt.s32.totalorder %v36_v59, 240  ;;  %p355_p11 = por %p354_p10, %p353_p9 }
  0x1e   :  { %p356_p12 = pnand %p355_p11, %p349_p8 }
  0x1f   :  { %75 = vrot.lane.b32.xlu1 %v47_v8, %s376_s21  ;;  %52 = vrot.lane.b32.xlu0 %v47_v8, %s377_s22 }
  0x23   :  { %98 = vrot.lane.b32.xlu1 %v47_v8, %s378_s0  ;;  %96 = vrot.lane.b32.xlu0 %v46_v7, %s378_s0 }
  0x27   :  { %121 = vrot.lane.b32.xlu1 %v47_v8, %s379_s23  ;;  %119 = vrot.lane.b32.xlu0 %v46_v7, %s379_s23 }
  0x8d   :  { %v74_v15 = vpop.permute.xlu1 %73  ;;  %v51_v16 = vpop.permute.xlu0 %50 }
  0x91   :  { %v76_v17 = vpop.permute.xlu1 %75  ;;  %v53_v18 = vpop.permute.xlu0 %52 }
  0x92   :  { %v78_v19 = vsel %vm77_vm0, %v74_v15, %v76_v17  ;;  %v79_v20 = vsel %vm77_vm0, %v76_v17, %v74_v15  ;;  %v55_v21 = vsel %vm54_vm1, %v51_v16, %v53_v18  ;;  %v56_v22 = vsel %vm54_vm1, %v53_v18, %v51_v16 }
  0x93   :  { %v80_v23 = vsel %vm71_vm2, %v78_v19, 0.0  ;;  %v81_v24 = vsel %vm72_vm3, %v79_v20, 0.0  ;;  %v57_v25 = vsel %vm37_vm4, %v56_v22, 0.0  ;;  %v58_v26 = vsel %vm38_vm5, %v55_v21, 0.0 }
  0x94   :  { %v84_v27 = vcombine.low %v80_v23, %v81_v24  ;;  %v61_v28 = vcombine.low %v57_v25, %v58_v26  ;;  %vm256_vm0 = vcmp.lt.s32.totalorder %v421_v12, 32  ;;  %vm144_vm1 = vcmp.ge.s32.totalorder %v421_v12, 32 }
  0x95   :  { %v99_v29 = vpop.permute.xlu1 %98  ;;  %v97_v30 = vpop.permute.xlu0 %96  ;;  %vm277_vm2 = vcmp.lt.s32.totalorder %v421_v12, 96  ;;  %vm147_vm3 = vcmp.lt.s32.totalorder %v36_v59, 224 }
  0x96   :  { %v68_v31 = vrot.slane %v61_v28, %v412_v5  ;;  %v101_v32 = vsel %vm100_vm6, %v97_v30, %v99_v29  ;;  %v102_v33 = vsel %vm100_vm6, %v99_v29, %v97_v30  ;;  %v91_v36 = vrot.slane %v84_v27, %v412_v5 }
  0x97   :  { %v103_v34 = vsel %vm94_vm7, %v102_v33, 0.0  ;;  %v104_v35 = vsel %vm95_vm8, %v101_v32, 0.0 }
  0x98   :  { %v70_v37 = vadd.f32 %v68_v31, %v414_v6  ;;  %v107_v38 = vcombine.low %v103_v34, %v104_v35 }
  0x99   :  { %v122_v39 = vpop.permute.xlu1 %121  ;;  %v120_v40 = vpop.permute.xlu0 %119 }
  0x9a   :  { %v434_v41 = vadd.f32 %v91_v36, %v70_v37  ;;  %v114_v42 = vrot.slane %v107_v38, %v412_v5  ;;  %v124_v43 = vsel %vm123_vm10, %v120_v40, %v122_v39  ;;  %v125_v44 = vsel %vm123_vm10, %v122_v39, %v120_v40 }
  0x9b   :  { %v126_v45 = vsel %vm117_vm9, %v124_v43, 0.0  ;;  %v127_v46 = vsel %vm118_vm11, %v125_v44, 0.0 }
  0x9c   :  { %v130_v47 = vcombine.low %v126_v45, %v127_v46  ;;  %v155_v48 = vrot.slane %v434_v41, %v412_v5  ;;  %v116_v49 = vadd.f32 %v114_v42, %v434_v41  ;;  %v297_v45 = vmul.f32 -5.2, %v414_v6 }
  0x9e   :  { %v137_v50 = vrot.slane %v130_v47, %v412_v5  ;;  %159 = vrot.lane.b32.xlu0 %v155_v48, %s380_s1  ;;  %v156_v51 = vcombine.high %v155_v48, %v155_v48 }
  0xa0   :  { %v139_v52 = vadd.f32 %v137_v50, %v116_v49  ;;  %161 = vrot.lane.b32.xlu1 %v156_v51, %s380_s1 }
  0xa2   :  { %v208_v53 = vrot.slane %v139_v52, %v412_v5  ;;  %180 = vrot.lane.b32.xlu0 %v155_v48, %s381_s26 }
  0xa4   :  { %182 = vrot.lane.b32.xlu1 %v156_v51, %s381_s26  ;;  %v209_v54 = vcombine.high %v208_v53, %v208_v53 }
  0xa6   :  { %212 = vrot.lane.b32.xlu0 %v208_v53, %s380_s1 }
  0xa8   :  { %214 = vrot.lane.b32.xlu1 %v209_v54, %s380_s1 }
  0xaa   :  { %232 = vrot.lane.b32.xlu0 %v208_v53, %s381_s26 }
  0xac   :  { %234 = vrot.lane.b32.xlu1 %v209_v54, %s381_s26 }
  0xae   :  { %252 = vrot.lane.b32.xlu0 %v208_v53, %s382_s27 }
  0xb0   :  { %254 = vrot.lane.b32.xlu1 %v209_v54, %s382_s27 }
  0xb2   :  { %273 = vrot.lane.b32.xlu0 %v208_v53, %s383_s28 }
  0xb4   :  { %275 = vrot.lane.b32.xlu1 %v209_v54, %s383_s28 }
 0x110   :  { %v160_v55 = vpop.permute.xlu0 %159 }
 0x112   :  { %v162_v56 = vpop.permute.xlu1 %161 }
 0x113   :  { %v165_v62 = vsel %vm163_vm12, %v162_v56, %v160_v55  ;;  %v164_v4 = vsel %vm163_vm12, %v160_v55, %v162_v56 }
 0x114   :  { %v181_v57 = vpop.permute.xlu0 %180  ;;  %v166_v7 = vsel %vm140_vm14, %v165_v62, 0.0 }
 0x115   :  { %v170_v17 = vcombine.low %v166_v7, %v164_v4 }
 0x116   :  { %v183_v58 = vpop.permute.xlu1 %182 }
 0x117   :  { %v186_v0 = vsel %vm184_vm13, %v183_v58, %v181_v57  ;;  %v185_v8 = vsel %vm184_vm13, %v181_v57, %v183_v58  ;;  %v177_v25 = vrot.slane %v170_v17, %v412_v5 }
 0x118   :  { %v213_v60 = vpop.permute.xlu0 %212  ;;  %v188_v10 = vsel %vm143_vm15, %v186_v0, 0.0 }
 0x119   :  { %v191_v19 = vcombine.low %v185_v8, %v188_v10  ;;  %v179_v36 = vadd.f32 %v177_v25, %v434_v41 }
 0x11a   :  { %v215_v61 = vpop.permute.xlu1 %214 }
 0x11b   :  { %v217_v63 = vsel %vm163_vm12, %v215_v61, %v213_v60  ;;  %v216_v1 = vsel %vm163_vm12, %v213_v60, %v215_v61  ;;  %v198_v28 = vrot.slane %v191_v19, %v412_v5 }
 0x11c   :  { %v218_v2 = vsel %vm140_vm14, %v217_v63, 0.0  ;;  %v233_v3 = vpop.permute.xlu0 %232 }
 0x11d   :  { %v222_v11 = vcombine.low %v218_v2, %v216_v1  ;;  %v200_v38 = vadd.f32 %v198_v28, %v179_v36 }
 0x11e   :  { %v235_v9 = vpop.permute.xlu1 %234 }
 0x11f   :  { %v236_v13 = vsel %vm184_vm13, %v233_v3, %v235_v9  ;;  %v237_v14 = vsel %vm184_vm13, %v235_v9, %v233_v3  ;;  %v229_v21 = vrot.slane %v222_v11, %v412_v5  ;;  %v295_v43 = vmul.f32 -0.8, %v200_v38 }
 0x120   :  { %v239_v15 = vsel %vm143_vm15, %v237_v14, 0.0  ;;  %v253_v16 = vpop.permute.xlu0 %252 }
 0x121   :  { %v242_v18 = vcombine.low %v236_v13, %v239_v15  ;;  %v231_v31 = vadd.f32 %v229_v21, %v139_v52 }
 0x122   :  { %v255_v20 = vpop.permute.xlu1 %254 }
 0x123   :  { %v257_v22 = vsel %vm256_vm0, %v253_v16, %v255_v20  ;;  %v258_v23 = vsel %vm256_vm0, %v255_v20, %v253_v16  ;;  %v249_v26 = vrot.slane %v242_v18, %v412_v5 }
 0x124   :  { %v259_v24 = vsel %vm144_vm1, %v258_v23, 0.0  ;;  %v274_v29 = vpop.permute.xlu0 %273 }
 0x125   :  { %v263_v27 = vcombine.low %v259_v24, %v257_v22  ;;  %v251_v37 = vadd.f32 %v249_v26, %v231_v31 }
 0x126   :  { %v276_v30 = vpop.permute.xlu1 %275 }
 0x127   :  { %v270_v32 = vrot.slane %v263_v27, %v412_v5  ;;  %v278_v33 = vsel %vm277_vm2, %v274_v29, %v276_v30  ;;  %v279_v34 = vsel %vm277_vm2, %v276_v30, %v274_v29 }
 0x128   :  { %v281_v35 = vsel %vm147_vm3, %v279_v34, 0.0 }
 0x129   :  { %v284_v12 = vcombine.low %v278_v33, %v281_v35  ;;  %v272_v39 = vadd.f32 %v270_v32, %v251_v37 }
 0x12b   :  { %v291_v40 = vrot.slane %v284_v12, %v412_v5 }
 0x12d   :  { %v293_v42 = vadd.f32 %v291_v40, %v272_v39 }
 0x12f   :  { %v294_v44 = vmul.f32 0.5, %v293_v42 }
 0x131   :  { %v296_v46 = vadd.f32 %v295_v43, %v294_v44 }
 0x133   :  { %v298_v47 = vadd.f32 %v297_v45, %v296_v46 }
 0x135   :  { %299 = vst [vmem:[#allocation5] sm:$0xf] %v298_v47 }
 0x136   :  { %359 = shalt.err (!%p356_p12)
}
 0x137   :  { %s360_s6 = scalar_lea.hbm %s479_s2, 64 }
 0x138   :  { %p361_p13 = scmp.ne.s32.totalorder %s479_s2, %s360_s6  ;;  %p364_p0 = scmp.lt.u32.totalorder %s360_s6, %s479_s2 }
 0x13a   :  { %p366_p1 = pnand %p364_p0, %p361_p13 }
 0x13c   :  { %369 = shalt.err (!%p366_p1)
}
 0x13d   :  { %309 = dma.vmem_to_hbm [thread:$0]  %s307_s30, 64, %s479_s2, [#allocation4]  }
 0x13e   :  { %372 = dma.done.wait [#allocation4], 64  }
 0x13f   :  { %373 = vsyncadd [#allocation4], 4294967232 }
 0x140   :  { %313 = vsyncpa [#allocation3], 1 }
 0x141   :  { %314 = vsyncpa [#allocation4], 1 }

</bundles_post_ra>
